<compile_context>
chip_gen: v7x
topology: tpu7x:2x2x1
jax: 0.10.0
libtpu: 0.0.40
codegen_flags: <defaults>
</compile_context>

<pallas_src>
import functools
import numpy as np
import jax
import jax.numpy as jnp
from jax import lax
from jax.experimental import pallas as pl
from jax.experimental.pallas import tpu as pltpu


# ----------------------------- Pallas kernel ------------------------------ #
def _psconv_kernel(x_ref, w_ref, o_ref, lhs_ref, *, n_tile, H, W, Cin, shifts):
    # x_ref:   (n_tile*H, W*Cin)   bf16 image tile, lane-dense minor axis
    # w_ref:   (S*W*Cin, W*Cout)   fused halo-free block-Toeplitz weight (bf16)
    # o_ref:   (n_tile*H, W*Cout)  lane-dense f32 output tile
    # lhs_ref: (n_tile*H, S*W*Cin) bf16 VMEM scratch holding the fused LHS
    WC = W * Cin
    xin = x_ref[...]                                   # one dense bf16 load

    # Build the fused LHS: one vertically-shifted slab per unique row shift.
    # Only the statically-known always-zero halo row bands are cleared; the
    # data region is fully overwritten every grid step.
    for s, dy in enumerate(shifts):
        col = s * WC                                   # lane-aligned (s * 128)
        if dy == 0:
            lhs_ref[:, col:col + WC] = xin             # unshifted slab, 1 copy
            continue
        h0 = max(0, -dy)                               # static Python bounds
        h1 = min(H, H - dy)
        for i in range(n_tile):
            row = i * H
            if h0 > 0:                                 # top halo band
                lhs_ref[row:row + h0, col:col + WC] = jnp.zeros(
                    (h0, WC), lhs_ref.dtype)
            if h1 < H:                                 # bottom halo band
                lhs_ref[row + h1:row + H, col:col + WC] = jnp.zeros(
                    (H - h1, WC), lhs_ref.dtype)
            lhs_ref[row + h0:row + h1, col:col + WC] = (
                xin[row + h0 + dy:row + h1 + dy, :])

    # Single fused MXU matmul: (n_tile*H, S*W*Cin) @ (S*W*Cin, W*Cout), f32 acc.
    out = jnp.dot(lhs_ref[...], w_ref[...],
                  preferred_element_type=jnp.float32)
    o_ref[...] = out.astype(o_ref.dtype)               # lane-dense store


def _pick_n_tile(N, H, target_rows=256):
    """Largest divisor of N whose tile fills ~target_rows MXU rows."""
    cap = max(1, target_rows // H)
    best = 1
    for t in range(1, N + 1):
        if t <= cap and N % t == 0:
            best = t
    return best


def psconv2d_pallas(x_nhwc, w_rhs, shifts, out_dtype=jnp.float32, n_tile=None):
    """x_nhwc: (N, H, W, Cin); w_rhs: (len(shifts)*W*Cin, W*Cout) bf16."""
    N, H, W, Cin = x_nhwc.shape
    S = len(shifts)
    K = S * W * Cin
    assert w_rhs.shape[0] == K and w_rhs.shape[1] % W == 0
    Cout = w_rhs.shape[1] // W
    if n_tile is None:
        n_tile = _pick_n_tile(N, H)
    assert N % n_tile == 0
    M = n_tile * H

    # bf16 activations: halves HBM->VMEM DMA and removes the in-kernel pack.
    x_flat = x_nhwc.astype(jnp.bfloat16).reshape(N * H, W * Cin)

    kernel = functools.partial(_psconv_kernel, n_tile=n_tile, H=H, W=W,
                               Cin=Cin, shifts=shifts)

    flops = 2 * (N * H) * K * (W * Cout)
    bytes_accessed = (N * H * W * Cin) * 2 + int(w_rhs.size) * 2 \
        + (N * H * W * Cout) * 4

    out_flat = pl.pallas_call(
        kernel,
        out_shape=jax.ShapeDtypeStruct((N * H, W * Cout), out_dtype),
        grid_spec=pltpu.PrefetchScalarGridSpec(
            num_scalar_prefetch=0,
            grid=(N // n_tile,),
            in_specs=[
                pl.BlockSpec((M, W * Cin), lambda n: (n, 0)),
                # TODO(synk): single-buffer this grid-invariant block via
                # pipeline_mode=pl.Buffered(1) when the production im2col
                # path (large weight tiles) lands.
                pl.BlockSpec((K, W * Cout), lambda n: (0, 0)),
            ],
            out_specs=pl.BlockSpec((M, W * Cout), lambda n: (n, 0)),
            scratch_shapes=[pltpu.VMEM((M, K), jnp.bfloat16)],
        ),
        compiler_params=pltpu.CompilerParams(
            dimension_semantics=("parallel",)),
        cost_estimate=pl.CostEstimate(
            flops=flops, transcendentals=0, bytes_accessed=bytes_accessed),
    )(x_flat, w_rhs)
    return out_flat.reshape(N, H, W, Cout)


# ------------------------ parameter setup (plain JAX) ---------------------- #
def build_mask(in_ch, out_ch, groups, parts):
    """Exact reproduction of the PyTorch mask construction."""
    mask = np.zeros((out_ch, in_ch // groups, 3, 3), dtype=bool)
    _in = in_ch // (groups * parts)
    _out = out_ch // (groups * parts)
    for i in range(parts):
        for j in range(groups):
            a = i + j * groups
            mask[a * _out:(a + 1) * _out, i * _in:(i + 1) * _in, :, :] = True
            b = (i + parts // 2) % parts + j * groups
            mask[b * _out:(b + 1) * _out, i * _in:(i + 1) * _in, :, :] = True
    return mask


def densify_grouped_weight(w, groups):
    """(Cout, Cin//groups, kh, kw) grouped weight -> block-diagonal dense."""
    Cout, cin_g, kh, kw = w.shape
    Cin = cin_g * groups
    cout_g = Cout // groups
    dense = jnp.zeros((Cout, Cin, kh, kw), w.dtype)
    for g in range(groups):
        dense = dense.at[g * cout_g:(g + 1) * cout_g,
                         g * cin_g:(g + 1) * cin_g].set(
                             w[g * cout_g:(g + 1) * cout_g])
    return dense


def merge_perm(in_ch, groups):
    """Channel permutation implementing chunk(groups)->chunk(2)->swap->cat."""
    cg = in_ch // groups
    half = cg // 2
    perm = []
    for g in range(groups):
        base = g * cg
        perm += list(range(base + half, base + cg))
        perm += list(range(base, base + half))
    return np.array(perm, dtype=np.int32)


def build_toeplitz_rhs(w_stack, W, dilations):
    """Fold kx taps into a halo-free (S*W*Cin, W*Cout) block-Toeplitz matrix.

    w_stack: (n_dil, 3, 3, Cin, Cout) dense weights, ordering (d, ky, kx).
    Slabs are keyed by unique vertical shift dy = (ky-1)*d; slabs sharing a
    shift (ky=1 of every dilation) are pre-summed into one block, and taps
    falling outside [0, W) horizontally are dropped (their LHS columns are
    provably zero).  Returns (rhs, shifts).
    """
    n_dil, kh, kw, Cin, Cout = w_stack.shape
    shifts = sorted({(ky - 1) * d for d in dilations for ky in range(kh)})
    S = len(shifts)
    rhs = np.zeros((S, W, Cin, W, Cout), np.float32)
    for di, d in enumerate(dilations):
        for ky in range(kh):
            s = shifts.index((ky - 1) * d)
            for kx in range(kw):
                for w in range(W):
                    wi = w + (kx - 1) * d
                    if 0 <= wi < W:
                        rhs[s, wi, :, w, :] += w_stack[di, ky, kx]
    return rhs.reshape(S * W * Cin, W * Cout), tuple(shifts)


def torch_style_conv(x_nchw, w, padding, dilation, groups):
    """Reference grouped conv matching torch.nn.Conv2d (stride=1, no bias)."""
    return lax.conv_general_dilated(
        x_nchw, w, window_strides=(1, 1),
        padding=((padding, padding), (padding, padding)),
        rhs_dilation=(dilation, dilation),
        dimension_numbers=("NCHW", "OIHW", "NCHW"),
        feature_group_count=groups,
        precision=lax.Precision.HIGHEST)


# ---------------------------------- main ----------------------------------- #
if __name__ == "__main__":
    # PSConv2d defaults: kernel=3, stride=1, padding=1, dilation=1,
    # groups=1, parts=4, bias=False
    N, Cin, H, W = 2, 8, 16, 16
    Cout = 8
    groups, parts = 1, 4
    gp = groups * parts
    dilations = (1, 2)            # gwconv/conv use dil 1, gwconv_shift dil 2

    key = jax.random.PRNGKey(0)
    k1, k2, k3, kx = jax.random.split(key, 4)
    gw_w = 0.1 * jax.random.normal(k1, (Cout, Cin // gp, 3, 3), jnp.float32)
    shift_w = 0.1 * jax.random.normal(k2, (Cout, Cin // gp, 3, 3), jnp.float32)
    conv_w = 0.1 * jax.random.normal(k3, (Cout, Cin // groups, 3, 3),
                                     jnp.float32)
    mask = build_mask(Cin, Cout, groups, parts)
    conv_w = jnp.where(jnp.asarray(mask), 0.0, conv_w)  # weight.data[mask] = 0

    x = jax.random.normal(kx, (N, Cin, H, W), jnp.float32)  # NCHW like torch

    # --- fold the three grouped convs into a (2, 3, 3, Cin, Cout) stack ---
    gw_dense = densify_grouped_weight(gw_w, gp)          # (Cout, Cin, 3, 3)
    conv_dense = densify_grouped_weight(conv_w, groups)  # (Cout, Cin, 3, 3)
    shift_dense = densify_grouped_weight(shift_w, gp)    # (Cout, Cin, 3, 3)
    perm = merge_perm(Cin, groups)
    inv_perm = np.argsort(perm)
    w_dil1 = gw_dense + conv_dense                       # disjoint supports
    w_dil2 = shift_dense[:, inv_perm]                    # shuffle folded in
    w_stack = jnp.stack([jnp.transpose(w_dil1, (2, 3, 1, 0)),
                         jnp.transpose(w_dil2, (2, 3, 1, 0))], axis=0)

    # --- fold horizontal taps into a halo-free block-Toeplitz RHS (bf16) ---
    w_rhs_np, shifts = build_toeplitz_rhs(np.asarray(w_stack), W, dilations)
    w_rhs = jnp.asarray(w_rhs_np).astype(jnp.bfloat16)

    # --- run the Pallas kernel (NHWC in, NHWC out) ---
    x_nhwc = jnp.transpose(x, (0, 2, 3, 1))
    out_nhwc = psconv2d_pallas(x_nhwc, w_rhs, shifts)
    out = jnp.transpose(out_nhwc, (0, 3, 1, 2))          # back to NCHW
    jax.block_until_ready(out)

    # --- pure-JAX reference mirroring the PyTorch forward exactly.
    # Operands are rounded to bf16 to match the kernel's MXU input precision
    # (accumulation stays f32 in both paths).  Tolerance additionally allows
    # for the pre-summed dy=0 slab: the kernel rounds the center-tap weight
    # SUM to bf16 while the reference rounds each addend separately.
    def rb(a):
        return a.astype(jnp.bfloat16).astype(jnp.float32)

    x_q, gw_q, conv_q, shift_q = rb(x), rb(gw_w), rb(conv_w), rb(shift_w)
    x_merge = x_q[:, perm]                               # chunk/swap/cat
    ref = (torch_style_conv(x_q, gw_q, padding=1, dilation=1, groups=gp)
           + torch_style_conv(x_q, conv_q, padding=1, dilation=1,
                              groups=groups)
           + torch_style_conv(x_merge, shift_q, padding=2, dilation=2,
                              groups=gp))
    out_np, ref_np = np.asarray(out), np.asarray(ref)
    if not np.allclose(out_np, ref_np, atol=1e-2, rtol=1e-2):
        raise AssertionError(
            f"Pallas PSConv2d mismatch, max err "
            f"{np.max(np.abs(out_np - ref_np))}")

    print("KERNEL_OK")
</pallas_src>

<mosaic_0001>
module attributes {stable_mosaic.version = 11 : i64} {
  func.func @_psconv_kernel(%arg0: i32, %arg1: memref<32x128xbf16, #tpu.memory_space<vmem>>, %arg2: memref<640x128xbf16, #tpu.memory_space<vmem>>, %arg3: memref<32x128xf32, #tpu.memory_space<vmem>>, %arg4: memref<32x640xbf16, #tpu.memory_space<vmem>>) attributes {dimension_semantics = [#tpu.dimension_semantics<parallel>], iteration_bounds = array<i64: 1>, scalar_prefetch = 0 : i64, scratch_operands = 1 : i64, tpu.core_type = #tpu.core_type<tc>, window_params = [{transform_indices = @transform_0, window_bounds = array<i64: 32, 128>}, {pipeline_mode = #tpu.pipeline_mode<synchronous>, transform_indices = @transform_1, window_bounds = array<i64: 640, 128>}, {transform_indices = @transform_2, window_bounds = array<i64: 32, 128>}]} {
    %c0 = arith.constant 0 : index
    %c0_0 = arith.constant 0 : index
    %0 = vector.load %arg1[%c0, %c0_0] : memref<32x128xbf16, #tpu.memory_space<vmem>>, vector<32x128xbf16>
    %cst = arith.constant 0.000000e+00 : bf16
    %1 = vector.broadcast %cst : bf16 to vector<2x128xbf16>
    %c0_1 = arith.constant 0 : index
    %c0_2 = arith.constant 0 : index
    %2 = vector.load %arg4[%c0_1, %c0_2] : memref<32x640xbf16, #tpu.memory_space<vmem>>, vector<2x128xbf16>
    tpu.vector_store %arg4[%c0_1, %c0_2], %1 {strides = array<i32>} : memref<32x640xbf16, #tpu.memory_space<vmem>>, vector<2x128xbf16>,
    %3 = vector.extract_strided_slice %0 {offsets = [0, 0], sizes = [14, 128], strides = [1, 1]} : vector<32x128xbf16> to vector<14x128xbf16>
    %c2 = arith.constant 2 : index
    %c0_3 = arith.constant 0 : index
    %4 = vector.load %arg4[%c2, %c0_3] : memref<32x640xbf16, #tpu.memory_space<vmem>>, vector<14x128xbf16>
    tpu.vector_store %arg4[%c2, %c0_3], %3 {strides = array<i32>} : memref<32x640xbf16, #tpu.memory_space<vmem>>, vector<14x128xbf16>,
    %cst_4 = arith.constant 0.000000e+00 : bf16
    %5 = vector.broadcast %cst_4 : bf16 to vector<2x128xbf16>
    %c16 = arith.constant 16 : index
    %c0_5 = arith.constant 0 : index
    %6 = vector.load %arg4[%c16, %c0_5] : memref<32x640xbf16, #tpu.memory_space<vmem>>, vector<2x128xbf16>
    tpu.vector_store %arg4[%c16, %c0_5], %5 {strides = array<i32>} : memref<32x640xbf16, #tpu.memory_space<vmem>>, vector<2x128xbf16>,
    %7 = vector.extract_strided_slice %0 {offsets = [16, 0], sizes = [14, 128], strides = [1, 1]} : vector<32x128xbf16> to vector<14x128xbf16>
    %c18 = arith.constant 18 : index
    %c0_6 = arith.constant 0 : index
    %8 = vector.load %arg4[%c18, %c0_6] : memref<32x640xbf16, #tpu.memory_space<vmem>>, vector<14x128xbf16>
    tpu.vector_store %arg4[%c18, %c0_6], %7 {strides = array<i32>} : memref<32x640xbf16, #tpu.memory_space<vmem>>, vector<14x128xbf16>,
    %cst_7 = arith.constant 0.000000e+00 : bf16
    %9 = vector.broadcast %cst_7 : bf16 to vector<1x128xbf16>
    %c0_8 = arith.constant 0 : index
    %c128 = arith.constant 128 : index
    %10 = vector.load %arg4[%c0_8, %c128] : memref<32x640xbf16, #tpu.memory_space<vmem>>, vector<1x128xbf16>
    tpu.vector_store %arg4[%c0_8, %c128], %9 {strides = array<i32>} : memref<32x640xbf16, #tpu.memory_space<vmem>>, vector<1x128xbf16>,
    %11 = vector.extract_strided_slice %0 {offsets = [0, 0], sizes = [15, 128], strides = [1, 1]} : vector<32x128xbf16> to vector<15x128xbf16>
    %c1 = arith.constant 1 : index
    %c128_9 = arith.constant 128 : index
    %12 = vector.load %arg4[%c1, %c128_9] : memref<32x640xbf16, #tpu.memory_space<vmem>>, vector<15x128xbf16>
    tpu.vector_store %arg4[%c1, %c128_9], %11 {strides = array<i32>} : memref<32x640xbf16, #tpu.memory_space<vmem>>, vector<15x128xbf16>,
    %cst_10 = arith.constant 0.000000e+00 : bf16
    %13 = vector.broadcast %cst_10 : bf16 to vector<1x128xbf16>
    %c16_11 = arith.constant 16 : index
    %c128_12 = arith.constant 128 : index
    %14 = vector.load %arg4[%c16_11, %c128_12] : memref<32x640xbf16, #tpu.memory_space<vmem>>, vector<1x128xbf16>
    tpu.vector_store %arg4[%c16_11, %c128_12], %13 {strides = array<i32>} : memref<32x640xbf16, #tpu.memory_space<vmem>>, vector<1x128xbf16>,
    %15 = vector.extract_strided_slice %0 {offsets = [16, 0], sizes = [15, 128], strides = [1, 1]} : vector<32x128xbf16> to vector<15x128xbf16>
    %c17 = arith.constant 17 : index
    %c128_13 = arith.constant 128 : index
    %16 = vector.load %arg4[%c17, %c128_13] : memref<32x640xbf16, #tpu.memory_space<vmem>>, vector<15x128xbf16>
    tpu.vector_store %arg4[%c17, %c128_13], %15 {strides = array<i32>} : memref<32x640xbf16, #tpu.memory_space<vmem>>, vector<15x128xbf16>,
    %c0_14 = arith.constant 0 : index
    %c256 = arith.constant 256 : index
    %17 = vector.load %arg4[%c0_14, %c256] : memref<32x640xbf16, #tpu.memory_space<vmem>>, vector<32x128xbf16>
    tpu.vector_store %arg4[%c0_14, %c256], %0 {strides = array<i32>} : memref<32x640xbf16, #tpu.memory_space<vmem>>, vector<32x128xbf16>,
    %cst_15 = arith.constant 0.000000e+00 : bf16
    %18 = vector.broadcast %cst_15 : bf16 to vector<1x128xbf16>
    %c15 = arith.constant 15 : index
    %c384 = arith.constant 384 : index
    %19 = vector.load %arg4[%c15, %c384] : memref<32x640xbf16, #tpu.memory_space<vmem>>, vector<1x128xbf16>
    tpu.vector_store %arg4[%c15, %c384], %18 {strides = array<i32>} : memref<32x640xbf16, #tpu.memory_space<vmem>>, vector<1x128xbf16>,
    %20 = vector.extract_strided_slice %0 {offsets = [1, 0], sizes = [15, 128], strides = [1, 1]} : vector<32x128xbf16> to vector<15x128xbf16>
    %c0_16 = arith.constant 0 : index
    %c384_17 = arith.constant 384 : index
    %21 = vector.load %arg4[%c0_16, %c384_17] : memref<32x640xbf16, #tpu.memory_space<vmem>>, vector<15x128xbf16>
    tpu.vector_store %arg4[%c0_16, %c384_17], %20 {strides = array<i32>} : memref<32x640xbf16, #tpu.memory_space<vmem>>, vector<15x128xbf16>,
    %cst_18 = arith.constant 0.000000e+00 : bf16
    %22 = vector.broadcast %cst_18 : bf16 to vector<1x128xbf16>
    %c31 = arith.constant 31 : index
    %c384_19 = arith.constant 384 : index
    %23 = vector.load %arg4[%c31, %c384_19] : memref<32x640xbf16, #tpu.memory_space<vmem>>, vector<1x128xbf16>
    tpu.vector_store %arg4[%c31, %c384_19], %22 {strides = array<i32>} : memref<32x640xbf16, #tpu.memory_space<vmem>>, vector<1x128xbf16>,
    %24 = vector.extract_strided_slice %0 {offsets = [17, 0], sizes = [15, 128], strides = [1, 1]} : vector<32x128xbf16> to vector<15x128xbf16>
    %c16_20 = arith.constant 16 : index
    %c384_21 = arith.constant 384 : index
    %25 = vector.load %arg4[%c16_20, %c384_21] : memref<32x640xbf16, #tpu.memory_space<vmem>>, vector<15x128xbf16>
    tpu.vector_store %arg4[%c16_20, %c384_21], %24 {strides = array<i32>} : memref<32x640xbf16, #tpu.memory_space<vmem>>, vector<15x128xbf16>,
    %cst_22 = arith.constant 0.000000e+00 : bf16
    %26 = vector.broadcast %cst_22 : bf16 to vector<2x128xbf16>
    %c14 = arith.constant 14 : index
    %c512 = arith.constant 512 : index
    %27 = vector.load %arg4[%c14, %c512] : memref<32x640xbf16, #tpu.memory_space<vmem>>, vector<2x128xbf16>
    tpu.vector_store %arg4[%c14, %c512], %26 {strides = array<i32>} : memref<32x640xbf16, #tpu.memory_space<vmem>>, vector<2x128xbf16>,
    %28 = vector.extract_strided_slice %0 {offsets = [2, 0], sizes = [14, 128], strides = [1, 1]} : vector<32x128xbf16> to vector<14x128xbf16>
    %c0_23 = arith.constant 0 : index
    %c512_24 = arith.constant 512 : index
    %29 = vector.load %arg4[%c0_23, %c512_24] : memref<32x640xbf16, #tpu.memory_space<vmem>>, vector<14x128xbf16>
    tpu.vector_store %arg4[%c0_23, %c512_24], %28 {strides = array<i32>} : memref<32x640xbf16, #tpu.memory_space<vmem>>, vector<14x128xbf16>,
    %cst_25 = arith.constant 0.000000e+00 : bf16
    %30 = vector.broadcast %cst_25 : bf16 to vector<2x128xbf16>
    %c30 = arith.constant 30 : index
    %c512_26 = arith.constant 512 : index
    %31 = vector.load %arg4[%c30, %c512_26] : memref<32x640xbf16, #tpu.memory_space<vmem>>, vector<2x128xbf16>
    tpu.vector_store %arg4[%c30, %c512_26], %30 {strides = array<i32>} : memref<32x640xbf16, #tpu.memory_space<vmem>>, vector<2x128xbf16>,
    %32 = vector.extract_strided_slice %0 {offsets = [18, 0], sizes = [14, 128], strides = [1, 1]} : vector<32x128xbf16> to vector<14x128xbf16>
    %c16_27 = arith.constant 16 : index
    %c512_28 = arith.constant 512 : index
    %33 = vector.load %arg4[%c16_27, %c512_28] : memref<32x640xbf16, #tpu.memory_space<vmem>>, vector<14x128xbf16>
    tpu.vector_store %arg4[%c16_27, %c512_28], %32 {strides = array<i32>} : memref<32x640xbf16, #tpu.memory_space<vmem>>, vector<14x128xbf16>,
    %c0_29 = arith.constant 0 : index
    %c0_30 = arith.constant 0 : index
    %34 = vector.load %arg4[%c0_29, %c0_30] : memref<32x640xbf16, #tpu.memory_space<vmem>>, vector<32x640xbf16>
    %c0_31 = arith.constant 0 : index
    %c0_32 = arith.constant 0 : index
    %35 = vector.load %arg2[%c0_31, %c0_32] : memref<640x128xbf16, #tpu.memory_space<vmem>>, vector<640x128xbf16>
    %cst_33 = arith.constant dense<0.000000e+00> : vector<32x128xf32>
    %36 = tpu.matmul %34, %35, %cst_33 {dimension_numbers = #tpu.dot_dimension_numbers<[1], [0], [0], [1], [0, 0, 1, 1], [], []>} : vector<32x640xbf16>, vector<640x128xbf16>, vector<32x128xf32> -> vector<32x128xf32>
    %c0_34 = arith.constant 0 : index
    %c0_35 = arith.constant 0 : index
    %37 = vector.load %arg3[%c0_34, %c0_35] : memref<32x128xf32, #tpu.memory_space<vmem>>, vector<32x128xf32>
    tpu.vector_store %arg3[%c0_34, %c0_35], %36 {strides = array<i32>} : memref<32x128xf32, #tpu.memory_space<vmem>>, vector<32x128xf32>,
    return
  }
  func.func @transform_0(%arg0: i32) -> (i32, i32) {
    %c0_i32 = arith.constant 0 : i32
    %c0_i32_0 = arith.constant 0 : i32
    return %arg0, %c0_i32 : i32, i32
  }
  func.func @transform_1(%arg0: i32) -> (i32, i32) {
    %c0_i32 = arith.constant 0 : i32
    %c0_i32_0 = arith.constant 0 : i32
    %c0_i32_1 = arith.constant 0 : i32
    return %c0_i32, %c0_i32_0 : i32, i32
  }
  func.func @transform_2(%arg0: i32) -> (i32, i32) {
    %c0_i32 = arith.constant 0 : i32
    %c0_i32_0 = arith.constant 0 : i32
    return %arg0, %c0_i32 : i32, i32
  }
}

</mosaic_0001>

<bundles_post_ra>
// kernel: tpu_custom_call.1
= control target key start
LH: loop header
LB: loop body
LE: loop exit
PB: predicated region body
PF: predicated region fallthrough
CT: control target
= control target key end

     0   :  { %7 = vsyncpa [#allocation4], 0  ;;  %s977_s0 = inlined_call_operand.hbm [shape: bf16[32,128], index: 0, kind: input, shape index: {}]   ;;  %s978_s1 = inlined_call_operand.hbm [shape: bf16[640,128], index: 1, kind: input, shape index: {}]   ;;  %s979_s2 = inlined_call_operand.hbm [shape: f32[32,128], index: 2, kind: output, shape index: {}]  }
   0x1   :  { %8 = vsyncpa [#allocation7], 0 }
   0x2   :  { %9 = vsyncpa [#allocation5], 0  ;;  %s881_s9 = smov [#allocation3]   ;;  %s809_s13 = scalar_lea.hbm %s977_s0, 256 }
   0x3   :  { %s15_s10 = sshll.u32 %s881_s9, 4  ;;  %p810_p0 = scmp.ne.s32.totalorder %s977_s0, %s809_s13  ;;  %s16_s10 = int_to_ptr.vmem [resolvable:$true] %s15_s10 }
   0x4   :  { %p813_p1 = scmp.lt.u32.totalorder %s809_s13, %s977_s0 }
   0x6   :  { %p815_p2 = pnand %p813_p1, %p810_p0 }
   0x8   :  { %818 = shalt.err (!%p815_p2)
}
   0x9   :  { %s819_s18 = scalar_lea.vmem %s16_s10, 256  ;;  %p824_p4 = scmp.lt.s32.totalorder %s16_s10, %s16_s10 }
   0xa   :  { %p820_p3 = scmp.ne.s32.totalorder %s16_s10, %s819_s18  ;;  %p825_p5 = scmp.lt.s32.totalorder %s819_s18, %s819_s18 }
   0xc   :  { %p826_p6 = por %p825_p5, %p824_p4 }
   0xe   :  { %p827_p7 = pnand %p826_p6, %p820_p3 }
  0x10   :  { %830 = shalt.err (!%p827_p7)
}
  0x11   :  { %s882_s19 = smov 64   ;;  %s883_s20 = smov 4  }
  0x12   :  { %21 = dma.hbm_to_vmem [thread:$0]  %s977_s0, 256, %s16_s10, [#allocation4], %s882_s19, %s882_s19, %s883_s20  }
  0x13   :  { %s884_s23 = smov [#allocation6]   ;;  %s831_s27 = scalar_lea.hbm %s978_s1, 5120 }
  0x14   :  { %s27_s24 = sshll.u32 %s884_s23, 4  ;;  %p832_p8 = scmp.ne.s32.totalorder %s978_s1, %s831_s27  ;;  %s28_s24 = int_to_ptr.vmem [resolvable:$true] %s27_s24 }
  0x15   :  { %p835_p9 = scmp.lt.u32.totalorder %s831_s27, %s978_s1 }
  0x17   :  { %p837_p10 = pnand %p835_p9, %p832_p8 }
  0x19   :  { %840 = shalt.err (!%p837_p10)
}
  0x1a   :  { %s841_s4 = scalar_lea.vmem %s28_s24, 5120  ;;  %p846_p12 = scmp.lt.s32.totalorder %s28_s24, %s28_s24 }
  0x1b   :  { %p842_p11 = scmp.ne.s32.totalorder %s28_s24, %s841_s4  ;;  %p847_p13 = scmp.lt.s32.totalorder %s841_s4, %s841_s4 }
  0x1d   :  { %p848_p0 = por %p847_p13, %p846_p12 }
  0x1f   :  { %p849_p1 = pnand %p848_p0, %p842_p11 }
  0x21   :  { %852 = shalt.err (!%p849_p1)
}
  0x22   :  { %33 = dma.hbm_to_vmem [thread:$0]  %s978_s1, 5120, %s28_s24, [#allocation7], %s882_s19, %s882_s19, %s883_s20  }
  0x23   :  { %875 = dma.done.wait [#allocation4], 256  }
  0x24   :  { %876 = vsyncadd [#allocation4], 4294967040 }
  0x25   :  { %877 = dma.done.wait [#allocation7], 5120  }
  0x26   :  { %878 = vsyncadd [#allocation7], 4294962176  ;;  %v885_v0 = vmov 0   ;;  %v767_v1 = vld [vmem:[#allocation6 + $0x40] sm:$0xff]   ;;  %v771_v5 = vld [vmem:[#allocation6 + $0x48] sm:$0xff]   ;;  %vm63_vm2 = vcmask 1040384  }
  0x27   :  { %45 = vst [vmem:[#allocation2] sm:$0x1] %v885_v0  ;;  %54 = vst [vmem:[#allocation2 + $0x28] sm:$0x1] %v885_v0  ;;  %v768_v2 = vld [vmem:[#allocation6 + $0xc0] sm:$0xff]   ;;  %673 = vmatprep.subr.bf16.mxu0 %v767_v1  ;;  %v772_v6 = vld [vmem:[#allocation6 + $0xc8] sm:$0xff]  }
  0x28   :  { %124 = vst [vmem:[#allocation2 + $0x20] sm:$0x80] %v885_v0  ;;  %128 = vst [vmem:[#allocation2 + $0x48] sm:$0x80] %v885_v0  ;;  %v769_v3 = vld [vmem:[#allocation6] sm:$0xff]   ;;  %701 = vmatprep.subr.bf16.mxu1 %v768_v2  ;;  %v773_v7 = vld [vmem:[#allocation6 + $0x8] sm:$0xff]  }
  0x29   :  { %v770_v4 = vld [vmem:[#allocation6 + $0x80] sm:$0xff]   ;;  %674 = vmatpush3.bf16.msra.mxu0 %v769_v3  ;;  %v774_v8 = vld [vmem:[#allocation6 + $0x88] sm:$0xff]   ;;  %v775_v9 = vld [vmem:[#allocation6 + $0x50] sm:$0xff]   ;;  %vm64_vm0 = vsmask.f32 256  ;;  %vm101_vm3 = vcmask 1047559  }
  0x2a   :  { %702 = vmatpush3.bf16.msra.mxu1 %v770_v4  ;;  %675 = vmatprep.subr.bf16.mxu0 %v771_v5  ;;  %v776_v10 = vld [vmem:[#allocation6 + $0xd0] sm:$0xff]   ;;  %v779_v13 = vld [vmem:[#allocation6 + $0x58] sm:$0xff]   ;;  %vm102_vm1 = vsmask.f32 7966  ;;  %v783_v17 = vld [vmem:[#allocation6 + $0x60] sm:$0xff]   ;;  %vm77_vm7 = vcmask 1047552  }
  0x2b   :  { %703 = vmatprep.subr.bf16.mxu1 %v772_v6  ;;  %v777_v11 = vld [vmem:[#allocation6 + $0x10] sm:$0xff]   ;;  %v780_v14 = vld [vmem:[#allocation6 + $0xd8] sm:$0xff]   ;;  %v784_v18 = vld [vmem:[#allocation6 + $0xe0] sm:$0xff]   ;;  %vm78_vm6 = vsmask.f32 7938  ;;  %s886_s1 = smov [#allocation8]  }
  0x2c   :  { %v778_v12 = vld [vmem:[#allocation6 + $0x90] sm:$0xff]   ;;  %v781_v15 = vld [vmem:[#allocation6 + $0x18] sm:$0xff]   ;;  %v785_v19 = vld [vmem:[#allocation6 + $0x20] sm:$0xff]   ;;  %vm110_vm8 = vsmask.f32 7424  ;;  %s618_s6 = sshll.u32 %s886_s1, 4  ;;  %s619_s6 = int_to_ptr.vmem [resolvable:$true] %s618_s6 }
  0x2d   :  { %676 = vmatpush3.bf16.msra.mxu0 %v773_v7  ;;  %v782_v16 = vld [vmem:[#allocation6 + $0x98] sm:$0xff]   ;;  %v786_v20 = vld [vmem:[#allocation6 + $0xa0] sm:$0xff]   ;;  %v787_v21 = vld [vmem:[#allocation6 + $0x68] sm:$0xff]   ;;  %s853_s7 = scalar_lea.vmem %s619_s6, 512  ;;  %p858_p3 = scmp.lt.s32.totalorder %s619_s6, %s619_s6 }
  0x2e   :  { %704 = vmatpush3.bf16.msra.mxu1 %v774_v8  ;;  %677 = vmatprep.subr.bf16.mxu0 %v775_v9  ;;  %v788_v22 = vld [vmem:[#allocation6 + $0xe8] sm:$0xff]   ;;  %vm929_vm4 = vmand %vm63_vm2, %vm64_vm0  ;;  %v791_v27 = vld [vmem:[#allocation6 + $0x70] sm:$0xff]   ;;  %p854_p2 = scmp.ne.s32.totalorder %s619_s6, %s853_s7  ;;  %p859_p4 = scmp.lt.s32.totalorder %s853_s7, %s853_s7 }
  0x2f   :  { %705 = vmatprep.subr.bf16.mxu1 %v776_v10  ;;  %v789_v23 = vld [vmem:[#allocation6 + $0x28] sm:$0xff]   ;;  %vm934_vm5 = vmand %vm101_vm3, %vm102_vm1  ;;  %v792_v28 = vld [vmem:[#allocation6 + $0xf0] sm:$0xff]  }
  0x30   :  { %v790_v24 = vld [vmem:[#allocation6 + $0xa8] sm:$0xff]   ;;  %v793_v29 = vld [vmem:[#allocation6 + $0x30] sm:$0xff]   ;;  %v795_v31 = vld [vmem:[#allocation6 + $0x78] sm:$0xff]   ;;  %p860_p5 = por %p859_p4, %p858_p3 }
  0x31   :  { %678 = vmatpush3.bf16.msra.mxu0 %v777_v11  ;;  %v794_v30 = vld [vmem:[#allocation6 + $0xb0] sm:$0xff]   ;;  %v796_v32 = vld [vmem:[#allocation6 + $0xf8] sm:$0xff]   ;;  %v66_v36 = vld [vmem:[#allocation2 + $0x8] sm:$0x1] }
  0x32   :  { %706 = vmatpush3.bf16.msra.mxu1 %v778_v12  ;;  %679 = vmatprep.subr.bf16.mxu0 %v779_v13  ;;  %v797_v33 = vld [vmem:[#allocation6 + $0x38] sm:$0xff]   ;;  %v799_v35 = vld [vmem:[#allocation3] sm:$0xff]   ;;  %v67_v38 = vsel %vm929_vm4, 0, %v66_v36  ;;  %v800_v43 = vld [vmem:[#allocation6 + $0x100] sm:$0xff]   ;;  %p861_p6 = pnand %p860_p5, %p854_p2 }
  0x33   :  { %707 = vmatprep.subr.bf16.mxu1 %v780_v14  ;;  %v798_v34 = vld [vmem:[#allocation6 + $0xb8] sm:$0xff]   ;;  %v70_v39 = vshrl.u32 %v799_v35, 16  ;;  %v73_v40 = vshll.u32 %v799_v35, 16  ;;  %68 = vst [vmem:[#allocation2 + $0x8] sm:$0x1] %v67_v38  ;;  %v51_v42 = vrot.slane %v799_v35, 7  ;;  %vm944_vm9 = vmand %vm77_vm7, %vm78_vm6 }
  0x34   :  { %v104_v37 = vld [vmem:[#allocation2 + $0x18] sm:$0x80]  ;;  %v125_v47 = vrot.slane %v799_v35, 1  ;;  %vm949_vm10 = vmand %vm77_vm7, %vm110_vm8  ;;  %v83_v52 = vld [vmem:[#allocation2 + $0x30] sm:$0x1] }
  0x35   :  { %680 = vmatpush3.bf16.msra.mxu0 %v781_v15  ;;  %v105_v41 = vsel %vm934_vm5, 0, %v104_v37  ;;  %v72_v44 = vrot.slane %v70_v39, 7  ;;  %v107_v45 = vrot.slane %v73_v40, 1  ;;  %53 = vst [vmem:[#allocation2] sm:$0xfe] %v51_v42  ;;  %v805_v51 = vld [vmem:[#allocation3 + $0x8] sm:$0xff]  }
  0x36   :  { %708 = vmatpush3.bf16.msra.mxu1 %v782_v16  ;;  %681 = vmatprep.subr.bf16.mxu0 %v783_v17  ;;  %106 = vst [vmem:[#allocation2 + $0x18] sm:$0x80] %v105_v41  ;;  %v115_v53 = vld [vmem:[#allocation2 + $0x40] sm:$0x80]  ;;  %127 = vst [vmem:[#allocation2 + $0x20] sm:$0x7f] %v125_v47 }
  0x37   :  { %709 = vmatprep.subr.bf16.mxu1 %v784_v18  ;;  %v75_v48 = vor.u32 %v73_v40, %v72_v44  ;;  %v108_v49 = vor.u32 %v107_v45, %v70_v39  ;;  %v84_v54 = vsel %vm929_vm4, 0, %v83_v52  ;;  %v116_v55 = vsel %vm934_vm5, 0, %v115_v53  ;;  %v801_v63 = vld [vmem:[#allocation6 + $0x108] sm:$0xff]   ;;  %v802_v6 = vld [vmem:[#allocation6 + $0x110] sm:$0xff]   ;;  %v803_v11 = vld [vmem:[#allocation6 + $0x118] sm:$0xff]  }
  0x38   :  { %85 = vst [vmem:[#allocation2 + $0x30] sm:$0x1] %v84_v54  ;;  %v87_v58 = vshrl.u32 %v805_v51, 16  ;;  %v90_v59 = vshll.u32 %v805_v51, 16  ;;  %117 = vst [vmem:[#allocation2 + $0x40] sm:$0x80] %v116_v55 }
  0x39   :  { %682 = vmatpush3.bf16.msra.mxu0 %v785_v19  ;;  %v60_v60 = vrot.slane %v805_v51, 7  ;;  %v129_v0 = vrot.slane %v805_v51, 1  ;;  %v804_v14 = vld [vmem:[#allocation6 + $0x120] sm:$0xff]   ;;  %v806_v15 = vld [vmem:[#allocation6 + $0x128] sm:$0xff]   ;;  %v807_v16 = vld [vmem:[#allocation6 + $0x130] sm:$0xff]  }
  0x3a   :  { %710 = vmatpush3.bf16.msra.mxu1 %v786_v20  ;;  %683 = vmatprep.subr.bf16.mxu0 %v787_v21  ;;  %v80_v56 = vld [vmem:[#allocation2 + $0x8] sm:$0xff]  ;;  %v89_v2 = vrot.slane %v87_v58, 7  ;;  %v118_v3 = vrot.slane %v90_v59, 1  ;;  %v808_v17 = vld [vmem:[#allocation6 + $0x138] sm:$0xff]  }
  0x3b   :  { %711 = vmatprep.subr.bf16.mxu1 %v788_v22  ;;  %v81_v61 = vsel %vm944_vm9, %v75_v48, %v80_v56  ;;  %62 = vst [vmem:[#allocation2 + $0x28] sm:$0xfe] %v60_v60  ;;  %131 = vst [vmem:[#allocation2 + $0x48] sm:$0x7f] %v129_v0 }
  0x3c   :  { %82 = vst [vmem:[#allocation2 + $0x8] sm:$0xff] %v81_v61  ;;  %494 = vmatprep.mubr.bf16.mxu0 %v81_v61  ;;  %v132_v1 = vld [vmem:[#allocation2] sm:$0xff]  ;;  %v92_v4 = vor.u32 %v90_v59, %v89_v2  ;;  %v119_v5 = vor.u32 %v118_v3, %v87_v58 }
  0x3d   :  { %684 = vmatpush3.bf16.msra.mxu0 %v789_v23  ;;  %v112_v57 = vld [vmem:[#allocation2 + $0x18] sm:$0xff]  ;;  %v136_v13 = vld [vmem:[#allocation2 + $0x20] sm:$0xff] }
  0x3e   :  { %712 = vmatpush3.bf16.msra.mxu1 %v790_v24  ;;  %685 = vmatprep.subr.bf16.mxu0 %v791_v27  ;;  %v113_v62 = vsel %vm949_vm10, %v108_v49, %v112_v57 }
  0x3f   :  { %713 = vmatprep.subr.bf16.mxu1 %v792_v28  ;;  %114 = vst [vmem:[#allocation2 + $0x18] sm:$0xff] %v113_v62  ;;  %543 = vmatprep.mubr.bf16.mxu1 %v113_v62  ;;  %v94_v7 = vld [vmem:[#allocation2 + $0x30] sm:$0xff]  ;;  %v121_v8 = vld [vmem:[#allocation2 + $0x40] sm:$0xff] }
  0x40   :  { %v95_v9 = vsel %vm944_vm9, %v92_v4, %v94_v7  ;;  %v122_v10 = vsel %vm949_vm10, %v119_v5, %v121_v8 }
  0x41   :  { %686 = vmatpush3.bf16.msra.mxu0 %v793_v29  ;;  %96 = vst [vmem:[#allocation2 + $0x30] sm:$0xff] %v95_v9  ;;  %123 = vst [vmem:[#allocation2 + $0x40] sm:$0xff] %v122_v10 }
  0x42   :  { %714 = vmatpush3.bf16.msra.mxu1 %v794_v30  ;;  %687 = vmatprep.subr.bf16.mxu0 %v795_v31  ;;  %v137_v12 = vld [vmem:[#allocation2 + $0x28] sm:$0xff] }
  0x43   :  { %715 = vmatprep.subr.bf16.mxu1 %v796_v32  ;;  %v141_v18 = vld [vmem:[#allocation2 + $0x48] sm:$0xff] }
  0x45   :  { %688 = vmatpush3.bf16.msra.mxu0 %v797_v33 }
  0x46   :  { %716 = vmatpush3.bf16.msra.mxu1 %v798_v34  ;;  %739 = vmatprep.subr.bf16.mxu0 %v800_v43 }
  0x48   :  { %495 = vmatmul.mubr.bf16.vlgmr.msra.gmra.mrb[0].mxu0 %v132_v1 }
  0x49   :  { %544 = vmatmul.mubr.bf16.vlgmr.msra.gmra.mrb[0].mxu1 %v799_v35  ;;  %740 = vmatpush3.bf16.msra.mxu0 %v800_v43 }
  0x4a   :  { %741 = vmatprep.subr.bf16.mxu0 %v801_v63  ;;  %502 = vmatprep.mubr.bf16.mxu0 %v95_v9 }
  0x4b   :  { %551 = vmatprep.mubr.bf16.mxu1 %v122_v10 }
  0x4d   :  { %742 = vmatpush3.bf16.msra.mxu0 %v801_v63 }
  0x4e   :  { %743 = vmatprep.subr.bf16.mxu0 %v802_v6 }
  0x50   :  { %503 = vmatmul.mubr.bf16.gmra.mrb[4].mxu0 %v137_v12 }
  0x51   :  { %552 = vmatmul.mubr.bf16.gmra.mrb[4].mxu1 %v805_v51  ;;  %744 = vmatpush3.bf16.msra.mxu0 %v802_v6 }
  0x52   :  { %755 = vmatprep.mubr.bf16.mxu0 %v136_v13  ;;  %745 = vmatprep.subr.bf16.mxu0 %v803_v11 }
  0x55   :  { %746 = vmatpush3.bf16.msra.mxu0 %v803_v11 }
  0x56   :  { %747 = vmatprep.subr.bf16.mxu0 %v804_v14 }
  0x59   :  { %748 = vmatpush3.bf16.msra.mxu0 %v804_v14 }
  0x5a   :  { %749 = vmatprep.subr.bf16.mxu0 %v806_v15 }
  0x5d   :  { %750 = vmatpush3.bf16.msra.mxu0 %v806_v15 }
  0x5e   :  { %751 = vmatprep.subr.bf16.mxu0 %v807_v16 }
  0x61   :  { %752 = vmatpush3.bf16.msra.mxu0 %v807_v16 }
  0x62   :  { %753 = vmatprep.subr.bf16.mxu0 %v808_v17 }
  0x65   :  { %754 = vmatpush3.bf16.msra.mxu0 %v808_v17 }
  0x68   :  { %756 = vmatmul.mubr.bf16.vlgmr.msra.gmra.mrb[8].mxu0 %v141_v18 }
 0x11b   :  { %v689_v19 = vpop.f32.mrb[0].mxu0 }
 0x11c   :  { %v717_v20 = vpop.f32.mrb[0].mxu1  ;;  %v690_v21 = vpop.f32.mrb[1].mxu0 }
 0x11d   :  { %v718_v22 = vpop.f32.mrb[1].mxu1  ;;  %v691_v23 = vadd.f32 %v690_v21, %v689_v19  ;;  %v692_v25 = vpop.f32.mrb[2].mxu0 }
 0x11e   :  { %v719_v24 = vadd.f32 %v718_v22, %v717_v20  ;;  %v720_v26 = vpop.f32.mrb[2].mxu1  ;;  %v693_v27 = vpop.f32.mrb[3].mxu0 }
 0x11f   :  { %v721_v28 = vpop.f32.mrb[3].mxu1  ;;  %v694_v29 = vadd.f32 %v693_v27, %v692_v25 }
 0x120   :  { %v722_v30 = vadd.f32 %v721_v28, %v720_v26  ;;  %v546_v31 = vadd.f32 %v719_v24, %v691_v23 }
 0x122   :  { %v549_v32 = vadd.f32 %v722_v30, %v694_v29 }
 0x123   :  { %v695_v33 = vpop.f32.mrb[4].mxu0 }
 0x124   :  { %v723_v34 = vpop.f32.mrb[4].mxu1  ;;  %v696_v35 = vpop.f32.mrb[5].mxu0 }
 0x125   :  { %v724_v36 = vpop.f32.mrb[5].mxu1  ;;  %v697_v37 = vadd.f32 %v696_v35, %v695_v33  ;;  %v698_v39 = vpop.f32.mrb[6].mxu0 }
 0x126   :  { %v725_v38 = vadd.f32 %v724_v36, %v723_v34  ;;  %v726_v40 = vpop.f32.mrb[6].mxu1  ;;  %v699_v41 = vpop.f32.mrb[7].mxu0 }
 0x127   :  { %v727_v42 = vpop.f32.mrb[7].mxu1  ;;  %v700_v43 = vadd.f32 %v699_v41, %v698_v39 }
 0x128   :  { %v728_v44 = vadd.f32 %v727_v42, %v726_v40  ;;  %v554_v45 = vadd.f32 %v725_v38, %v697_v37 }
 0x12a   :  { %v557_v46 = vadd.f32 %v728_v44, %v700_v43 }
 0x13b   :  { %v757_v47 = vpop.f32.mrb[8].mxu0 }
 0x13c   :  { %v603_v48 = vadd.f32 %v757_v47, %v554_v45  ;;  %v594_v49 = vpop.f32.mrb[9].mxu0 }
 0x13d   :  { %v595_v50 = vadd.f32 %v594_v49, %v546_v31  ;;  %v758_v51 = vpop.f32.mrb[10].mxu0 }
 0x13e   :  { %611 = vst [vmem:[#allocation8 + $0x10] sm:$0xff] %v603_v48  ;;  %v606_v52 = vadd.f32 %v758_v51, %v557_v46  ;;  %v597_v53 = vpop.f32.mrb[11].mxu0 }
 0x13f   :  { %609 = vst [vmem:[#allocation8] sm:$0xff] %v595_v50  ;;  %v598_v54 = vadd.f32 %v597_v53, %v549_v32 }
 0x140   :  { %612 = vst [vmem:[#allocation8 + $0x18] sm:$0xff] %v606_v52 }
 0x141   :  { %610 = vst [vmem:[#allocation8 + $0x8] sm:$0xff] %v598_v54 }
 0x142   :  { %864 = shalt.err (!%p861_p6)
}
 0x143   :  { %s865_s10 = scalar_lea.hbm %s979_s2, 512 }
 0x144   :  { %p866_p7 = scmp.ne.s32.totalorder %s979_s2, %s865_s10  ;;  %p869_p8 = scmp.lt.u32.totalorder %s865_s10, %s979_s2 }
 0x146   :  { %p871_p9 = pnand %p869_p8, %p866_p7 }
 0x148   :  { %874 = shalt.err (!%p871_p9)
}
 0x149   :  { %s887_s15 = smov 128   ;;  %s888_s16 = smov 8  }
 0x14a   :  { %624 = dma.vmem_to_hbm [thread:$0]  %s619_s6, 512, %s979_s2, [#allocation5], %s887_s15, %s887_s15, %s888_s16  }
 0x14b   :  { %879 = dma.done.wait [#allocation5], 512  }
 0x14c   :  { %880 = vsyncadd [#allocation5], 4294966784 }
 0x14d   :  { %628 = vsyncpa [#allocation4], 1 }
 0x14e   :  { %629 = vsyncpa [#allocation7], 1 }
 0x14f   :  { %630 = vsyncpa [#allocation5], 1 }

</bundles_post_ra>
